<compile_context>
chip_gen: v7x
topology: tpu7x:2x2x1
jax: 0.10.0
libtpu: 0.0.40
codegen_flags: <defaults>
</compile_context>

<pallas_src>
import functools
import math

import jax
import jax.numpy as jnp
from jax.experimental import pallas as pl
from jax.experimental.pallas import tpu as pltpu

LOG_STD_MIN = -20.0
LOG_STD_MAX = 2.0
_MAX_TB = 512           # batch-tile cap (review sweet spot; keeps grid >= 2 for B > 512)
_HALF_LOG_2PI = 0.5 * math.log(2.0 * math.pi)
_LOG_2 = math.log(2.0)


def _make_policy_kernel(stochastic: bool, max_action: float, matmul_dtype):
    """Builds the fused forward kernel (with or without an eps input)."""

    def kernel(*refs):
        if stochastic:
            (state_ref, eps_ref, w1_ref, b1_ref, w2_ref, b2_ref,
             wm_ref, bm_ref, ls_ref, act_ref, logp_ref) = refs
            eps = eps_ref[...]                              # (TB, A) f32
        else:
            (state_ref, w1_ref, b1_ref, w2_ref, b2_ref,
             wm_ref, bm_ref, ls_ref, act_ref, logp_ref) = refs
            eps = None

        x = state_ref[...]                                  # (TB, S) f32

        def mm(a, b_ref):
            # MXU matmul: bf16 (or f32) ingestion, f32 accumulation.
            return jnp.dot(a.astype(matmul_dtype), b_ref[...],
                           preferred_element_type=jnp.float32)

        h1 = jnp.maximum(mm(x, w1_ref) + b1_ref[...], 0.0)    # (TB, 64) f32
        h2 = jnp.maximum(mm(h1, w2_ref) + b2_ref[...], 0.0)   # (TB, 32) f32
        mean = mm(h2, wm_ref) + bm_ref[...]                   # (TB, A)  f32

        log_std = jnp.clip(ls_ref[...], LOG_STD_MIN, LOG_STD_MAX)   # (1, A)
        std = jnp.exp(log_std)

        if eps is None:
            pre = mean
            z = jnp.zeros_like(mean)
        else:
            pre = mean + std * eps
            z = eps                        # == (pre - mean) / std exactly

        action = jnp.tanh(pre)

        # Normal(mean, std).log_prob(pre), per action dim.
        normal_lp = -0.5 * z * z - log_std - _HALF_LOG_2PI
        # TanhTransform.log_abs_det_jacobian = 2*(log2 - pre - softplus(-2*pre)).
        t = -2.0 * pre
        softplus_t = jnp.maximum(t, 0.0) + jnp.log1p(jnp.exp(-jnp.abs(t)))
        log_det = 2.0 * (_LOG_2 - pre - softplus_t)
        per_dim = normal_lp - log_det                        # (TB, A)

        # Lane-dense stores: batch on the 128-lane axis.
        act_ref[...] = jnp.transpose(max_action * action).astype(act_ref.dtype)      # (A, TB)
        logp_ref[...] = jnp.sum(jnp.transpose(per_dim), axis=0,
                                keepdims=True).astype(logp_ref.dtype)                # (1, TB)

    return kernel


@functools.partial(
    jax.jit,
    static_argnames=("max_action", "deterministic", "repeat", "matmul_dtype"))
def gaussian_policy_forward(state, eps, w1, b1, w2, b2, w_mean, b_mean, log_std,
                            *, max_action, deterministic=False, repeat=None,
                            matmul_dtype=jnp.bfloat16):
    """Fused GaussianPolicy forward.  Returns (max_action * action, log_prob).

    state: (B, S).  eps: (B, A) or (B, repeat, A) standard-normal noise
    (ignored / may be None when deterministic).  Output shapes match torch:
    (B, A), (B,) — or (B, repeat, A), (B, repeat) when `repeat` is given.
    """
    state = jnp.asarray(state, jnp.float32)
    b0, S = state.shape
    H1 = w1.shape[1]
    H2 = w2.shape[1]
    A = w_mean.shape[1]
    R = 1 if repeat is None else int(repeat)
    stochastic = not deterministic

    # Batch tile: whole batch if it fits, else 512-row tiles (>=2 tiles for
    # large B so both v7x TensorCores get work).  No padding: the last tile is
    # ragged; its garbage rows are row-local and sliced off below.
    TB = b0 if b0 <= _MAX_TB else _MAX_TB
    n_tiles = -(-b0 // TB)

    if stochastic:
        assert eps is not None, "eps noise is required when deterministic=False"
        eps = jnp.asarray(eps, jnp.float32)
        if repeat is None:
            eps_k = eps.reshape(1, b0, A)                    # (R=1, B, A)
        else:
            eps_k = jnp.swapaxes(eps.reshape(b0, R, A), 0, 1)  # (R, B, A)

    def const_spec(shape):
        return pl.BlockSpec(shape, lambda i, r: (0, 0))

    in_specs = [pl.BlockSpec((TB, S), lambda i, r: (i, 0))]   # state tile
    inputs = [state]
    if stochastic:
        in_specs.append(pl.BlockSpec((None, TB, A), lambda i, r: (r, i, 0)))
        inputs.append(eps_k)
    in_specs += [
        const_spec((S, H1)), const_spec((1, H1)),             # w1, b1 (resident)
        const_spec((H1, H2)), const_spec((1, H2)),            # w2, b2
        const_spec((H2, A)), const_spec((1, A)),              # w_mean, b_mean
        const_spec((1, A)),                                   # log_std
    ]
    inputs += [
        w1.astype(matmul_dtype), b1.astype(jnp.float32).reshape(1, H1),
        w2.astype(matmul_dtype), b2.astype(jnp.float32).reshape(1, H2),
        w_mean.astype(matmul_dtype), b_mean.astype(jnp.float32).reshape(1, A),
        log_std.astype(jnp.float32).reshape(1, A),
    ]

    # Lane-dense transposed output slabs (batch on the lane axis).
    out_shape = (jax.ShapeDtypeStruct((n_tiles, R, A, TB), jnp.float32),
                 jax.ShapeDtypeStruct((n_tiles, R, 1, TB), jnp.float32))
    out_specs = [pl.BlockSpec((None, None, A, TB), lambda i, r: (i, r, 0, 0)),
                 pl.BlockSpec((None, None, 1, TB), lambda i, r: (i, r, 0, 0))]

    rows = n_tiles * TB * R
    w_itemsize = jnp.dtype(matmul_dtype).itemsize
    cost = pl.CostEstimate(
        flops=int(2 * rows * (S * H1 + H1 * H2 + H2 * A)),
        transcendentals=int(4 * rows * A),
        bytes_accessed=int(b0 * S * 4
                           + (R * b0 * A * 4 if stochastic else 0)
                           + (S * H1 + H1 * H2 + H2 * A) * w_itemsize
                           + (H1 + H2 + 2 * A) * 4
                           + n_tiles * R * (A + 1) * TB * 4))

    kernel = _make_policy_kernel(stochastic, float(max_action), matmul_dtype)

    act_t, logp_t = pl.pallas_call(
        kernel,
        out_shape=out_shape,
        grid_spec=pltpu.PrefetchScalarGridSpec(
            num_scalar_prefetch=0,
            grid=(n_tiles, R),            # repeat is the inner axis -> the state
            in_specs=in_specs,            # tile is fetched once per batch tile.
            out_specs=out_specs),
        compiler_params=pltpu.CompilerParams(
            dimension_semantics=("parallel", "arbitrary")),
        cost_estimate=cost,
    )(*inputs)

    # Undo the lane-dense layout (cheap wrapper-side plumbing).
    act = jnp.transpose(act_t, (0, 3, 1, 2)).reshape(n_tiles * TB, R, A)[:b0]
    logp = jnp.transpose(logp_t, (0, 3, 1, 2)).reshape(n_tiles * TB, R)[:b0]
    if repeat is None:
        return act[:, 0, :], logp[:, 0]
    return act, logp


def _reference_forward(state, eps, w1, b1, w2, b2, w_mean, b_mean, log_std,
                       *, max_action, deterministic=False, repeat=None,
                       matmul_dtype=jnp.float32):
    """Pure-JAX reference mirroring the PyTorch forward()."""
    if repeat is not None:
        state = jnp.repeat(state[:, None, :], repeat, axis=1)   # (B, R, S)

    if jnp.dtype(matmul_dtype) == jnp.dtype(jnp.float32):
        def mm(a, b):
            return jnp.dot(a, b, precision=jax.lax.Precision.HIGHEST)
    else:
        def mm(a, b):
            return jnp.dot(a.astype(matmul_dtype), b.astype(matmul_dtype),
                           preferred_element_type=jnp.float32)

    h1 = jax.nn.relu(mm(state, w1) + b1)
    h2 = jax.nn.relu(mm(h1, w2) + b2)
    mean = mm(h2, w_mean) + b_mean
    ls = jnp.clip(log_std, LOG_STD_MIN, LOG_STD_MAX)
    std = jnp.exp(ls)
    if deterministic:
        pre = mean
        z = jnp.zeros_like(mean)
    else:
        pre = mean + std * eps
        z = eps
    action = jnp.tanh(pre)
    normal_lp = -0.5 * z * z - ls - 0.5 * jnp.log(2.0 * jnp.pi)
    log_det = 2.0 * (jnp.log(2.0) - pre - jax.nn.softplus(-2.0 * pre))
    logp = jnp.sum(normal_lp - log_det, axis=-1)
    return max_action * action, logp


if __name__ == "__main__":
    key = jax.random.PRNGKey(0)
    ks = jax.random.split(key, 9)

    batch, state_dim, action_dim = 37, 17, 6      # odd sizes exercise raggedness
    hidden1, hidden2 = 64, 32
    max_action = 2.0

    state = jax.random.normal(ks[0], (batch, state_dim), dtype=jnp.float32)
    eps = jax.random.normal(ks[1], (batch, action_dim), dtype=jnp.float32)

    def _init(k, fan_in, shape):
        bound = 1.0 / math.sqrt(fan_in)
        return jax.random.uniform(k, shape, jnp.float32, -bound, bound)

    w1 = _init(ks[2], state_dim, (state_dim, hidden1))
    b1 = _init(ks[3], state_dim, (hidden1,))
    w2 = _init(ks[4], hidden1, (hidden1, hidden2))
    b2 = _init(ks[5], hidden1, (hidden2,))
    w_mean = _init(ks[6], hidden2, (hidden2, action_dim))
    b_mean = _init(ks[7], hidden2, (action_dim,))
    log_std = jnp.zeros((action_dim,), dtype=jnp.float32)
    params = (w1, b1, w2, b2, w_mean, b_mean, log_std)

    def check(got, want, atol, rtol, name):
        err = float(jnp.max(jnp.abs(got - want)))
        assert jnp.allclose(got, want, atol=atol, rtol=rtol), (name, err)

    # 1) Stochastic, exact-f32 matmuls (semantics check; loose tolerance only to
    #    absorb any backend matmul-precision defaults).
    act, logp = gaussian_policy_forward(state, eps, *params,
                                        max_action=max_action,
                                        deterministic=False,
                                        matmul_dtype=jnp.float32)
    act, logp = jax.block_until_ready((act, logp))
    a_ref, l_ref = _reference_forward(state, eps, *params, max_action=max_action,
                                      deterministic=False,
                                      matmul_dtype=jnp.float32)
    assert act.shape == (batch, action_dim) and logp.shape == (batch,)
    check(act, a_ref, 1e-2, 1e-2, "action/f32")
    check(logp, l_ref, 1e-1, 1e-1, "logp/f32")

    # 2) Stochastic, default bf16-matmul fast path vs. bf16-matmul reference
    #    (tight: both round inputs to bf16 and accumulate in f32).
    act_b, logp_b = gaussian_policy_forward(state, eps, *params,
                                            max_action=max_action,
                                            deterministic=False)
    act_b, logp_b = jax.block_until_ready((act_b, logp_b))
    a_refb, l_refb = _reference_forward(state, eps, *params, max_action=max_action,
                                        deterministic=False,
                                        matmul_dtype=jnp.bfloat16)
    check(act_b, a_refb, 1e-3, 1e-3, "action/bf16")
    check(logp_b, l_refb, 1e-2, 1e-2, "logp/bf16")

    # 3) Deterministic path (kernel variant with no eps input at all).
    act_d, logp_d = gaussian_policy_forward(state, None, *params,
                                            max_action=max_action,
                                            deterministic=True)
    act_d, logp_d = jax.block_until_ready((act_d, logp_d))
    a_refd, l_refd = _reference_forward(state, None, *params, max_action=max_action,
                                        deterministic=True,
                                        matmul_dtype=jnp.bfloat16)
    check(act_d, a_refd, 1e-3, 1e-3, "action/det")
    check(logp_d, l_refd, 1e-2, 1e-2, "logp/det")

    # 4) repeat path (state is NOT materialized repeat-x in HBM).
    repeat = 3
    eps_r = jax.random.normal(ks[8], (batch, repeat, action_dim), dtype=jnp.float32)
    act_r, logp_r = gaussian_policy_forward(state, eps_r, *params,
                                            max_action=max_action,
                                            deterministic=False, repeat=repeat)
    act_r, logp_r = jax.block_until_ready((act_r, logp_r))
    a_refr, l_refr = _reference_forward(state, eps_r, *params, max_action=max_action,
                                        deterministic=False, repeat=repeat,
                                        matmul_dtype=jnp.bfloat16)
    assert act_r.shape == (batch, repeat, action_dim)
    assert logp_r.shape == (batch, repeat)
    check(act_r, a_refr, 1e-3, 1e-3, "action/repeat")
    check(logp_r, l_refr, 1e-2, 1e-2, "logp/repeat")

    print("KERNEL_OK")
</pallas_src>

<mosaic_0001>
module attributes {stable_mosaic.version = 11 : i64} {
  func.func @kernel(%arg0: i32, %arg1: i32, %arg2: memref<37x17xf32, #tpu.memory_space<vmem>>, %arg3: memref<1x37x6xf32, #tpu.memory_space<vmem>>, %arg4: memref<17x64xf32, #tpu.memory_space<vmem>>, %arg5: memref<1x64xf32, #tpu.memory_space<vmem>>, %arg6: memref<64x32xf32, #tpu.memory_space<vmem>>, %arg7: memref<1x32xf32, #tpu.memory_space<vmem>>, %arg8: memref<32x6xf32, #tpu.memory_space<vmem>>, %arg9: memref<1x6xf32, #tpu.memory_space<vmem>>, %arg10: memref<1x6xf32, #tpu.memory_space<vmem>>, %arg11: memref<1x1x6x37xf32, #tpu.memory_space<vmem>>, %arg12: memref<1x1x1x37xf32, #tpu.memory_space<vmem>>) attributes {dimension_semantics = [#tpu.dimension_semantics<parallel>, #tpu.dimension_semantics<arbitrary>], iteration_bounds = array<i64: 1, 1>, scalar_prefetch = 0 : i64, scratch_operands = 0 : i64, tpu.core_type = #tpu.core_type<tc>, window_params = [{transform_indices = @transform_0, window_bounds = array<i64: 37, 17>}, {transform_indices = @transform_1, window_bounds = array<i64: 1, 37, 6>}, {pipeline_mode = #tpu.pipeline_mode<synchronous>, transform_indices = @transform_2, window_bounds = array<i64: 17, 64>}, {pipeline_mode = #tpu.pipeline_mode<synchronous>, transform_indices = @transform_3, window_bounds = array<i64: 1, 64>}, {pipeline_mode = #tpu.pipeline_mode<synchronous>, transform_indices = @transform_4, window_bounds = array<i64: 64, 32>}, {pipeline_mode = #tpu.pipeline_mode<synchronous>, transform_indices = @transform_5, window_bounds = array<i64: 1, 32>}, {pipeline_mode = #tpu.pipeline_mode<synchronous>, transform_indices = @transform_6, window_bounds = array<i64: 32, 6>}, {pipeline_mode = #tpu.pipeline_mode<synchronous>, transform_indices = @transform_7, window_bounds = array<i64: 1, 6>}, {pipeline_mode = #tpu.pipeline_mode<synchronous>, transform_indices = @transform_8, window_bounds = array<i64: 1, 6>}, {transform_indices = @transform_9, window_bounds = array<i64: 1, 1, 6, 37>}, {transform_indices = @transform_10, window_bounds = array<i64: 1, 1, 1, 37>}]} {
    %c0 = arith.constant 0 : index
    %c0_0 = arith.constant 0 : index
    %c0_1 = arith.constant 0 : index
    %0 = vector.load %arg3[%c0, %c0_0, %c0_1] : memref<1x37x6xf32, #tpu.memory_space<vmem>>, vector<1x37x6xf32>
    %1 = vector.shape_cast %0 : vector<1x37x6xf32> to vector<37x6xf32>
    %c0_2 = arith.constant 0 : index
    %c0_3 = arith.constant 0 : index
    %2 = vector.load %arg2[%c0_2, %c0_3] : memref<37x17xf32, #tpu.memory_space<vmem>>, vector<37x17xf32>
    %c0_4 = arith.constant 0 : index
    %c0_5 = arith.constant 0 : index
    %3 = vector.load %arg4[%c0_4, %c0_5] : memref<17x64xf32, #tpu.memory_space<vmem>>, vector<17x64xf32>
    %cst = arith.constant dense<0.000000e+00> : vector<37x64xf32>
    %4 = tpu.matmul %2, %3, %cst {dimension_numbers = #tpu.dot_dimension_numbers<[1], [0], [0], [1], [0, 0, 1, 1], [], []>} : vector<37x17xf32>, vector<17x64xf32>, vector<37x64xf32> -> vector<37x64xf32>
    %c0_6 = arith.constant 0 : index
    %c0_7 = arith.constant 0 : index
    %5 = vector.load %arg5[%c0_6, %c0_7] : memref<1x64xf32, #tpu.memory_space<vmem>>, vector<1x64xf32>
    %6 = vector.broadcast %5 : vector<1x64xf32> to vector<37x64xf32>
    %7 = arith.addf %4, %6 : vector<37x64xf32>
    %cst_8 = arith.constant 0.000000e+00 : f32
    %8 = vector.broadcast %cst_8 : f32 to vector<37x64xf32>
    %9 = arith.maximumf %7, %8 : vector<37x64xf32>
    %c0_9 = arith.constant 0 : index
    %c0_10 = arith.constant 0 : index
    %10 = vector.load %arg6[%c0_9, %c0_10] : memref<64x32xf32, #tpu.memory_space<vmem>>, vector<64x32xf32>
    %cst_11 = arith.constant dense<0.000000e+00> : vector<37x32xf32>
    %11 = tpu.matmul %9, %10, %cst_11 {dimension_numbers = #tpu.dot_dimension_numbers<[1], [0], [0], [1], [0, 0, 1, 1], [], []>} : vector<37x64xf32>, vector<64x32xf32>, vector<37x32xf32> -> vector<37x32xf32>
    %c0_12 = arith.constant 0 : index
    %c0_13 = arith.constant 0 : index
    %12 = vector.load %arg7[%c0_12, %c0_13] : memref<1x32xf32, #tpu.memory_space<vmem>>, vector<1x32xf32>
    %13 = vector.broadcast %12 : vector<1x32xf32> to vector<37x32xf32>
    %14 = arith.addf %11, %13 : vector<37x32xf32>
    %cst_14 = arith.constant 0.000000e+00 : f32
    %15 = vector.broadcast %cst_14 : f32 to vector<37x32xf32>
    %16 = arith.maximumf %14, %15 : vector<37x32xf32>
    %c0_15 = arith.constant 0 : index
    %c0_16 = arith.constant 0 : index
    %17 = vector.load %arg8[%c0_15, %c0_16] : memref<32x6xf32, #tpu.memory_space<vmem>>, vector<32x6xf32>
    %cst_17 = arith.constant dense<0.000000e+00> : vector<37x6xf32>
    %18 = tpu.matmul %16, %17, %cst_17 {dimension_numbers = #tpu.dot_dimension_numbers<[1], [0], [0], [1], [0, 0, 1, 1], [], []>} : vector<37x32xf32>, vector<32x6xf32>, vector<37x6xf32> -> vector<37x6xf32>
    %c0_18 = arith.constant 0 : index
    %c0_19 = arith.constant 0 : index
    %19 = vector.load %arg9[%c0_18, %c0_19] : memref<1x6xf32, #tpu.memory_space<vmem>>, vector<1x6xf32>
    %20 = vector.broadcast %19 : vector<1x6xf32> to vector<37x6xf32>
    %21 = arith.addf %18, %20 : vector<37x6xf32>
    %c0_20 = arith.constant 0 : index
    %c0_21 = arith.constant 0 : index
    %22 = vector.load %arg10[%c0_20, %c0_21] : memref<1x6xf32, #tpu.memory_space<vmem>>, vector<1x6xf32>
    %cst_22 = arith.constant -2.000000e+01 : f32
    %cst_23 = arith.constant 2.000000e+00 : f32
    %23 = vector.broadcast %cst_22 : f32 to vector<1x6xf32>
    %24 = arith.maximumf %23, %22 : vector<1x6xf32>
    %25 = vector.broadcast %cst_23 : f32 to vector<1x6xf32>
    %26 = arith.minimumf %25, %24 : vector<1x6xf32>
    %27 = math.exp %26 : vector<1x6xf32>
    %28 = vector.broadcast %27 : vector<1x6xf32> to vector<37x6xf32>
    %29 = arith.mulf %28, %1 : vector<37x6xf32>
    %30 = arith.addf %21, %29 : vector<37x6xf32>
    %31 = math.tanh %30 : vector<37x6xf32>
    %cst_24 = arith.constant -5.000000e-01 : f32
    %32 = vector.broadcast %cst_24 : f32 to vector<37x6xf32>
    %33 = arith.mulf %32, %1 : vector<37x6xf32>
    %34 = arith.mulf %33, %1 : vector<37x6xf32>
    %35 = vector.broadcast %26 : vector<1x6xf32> to vector<37x6xf32>
    %36 = arith.subf %34, %35 : vector<37x6xf32>
    %cst_25 = arith.constant 0.918938517 : f32
    %37 = vector.broadcast %cst_25 : f32 to vector<37x6xf32>
    %38 = arith.subf %36, %37 : vector<37x6xf32>
    %cst_26 = arith.constant -2.000000e+00 : f32
    %39 = vector.broadcast %cst_26 : f32 to vector<37x6xf32>
    %40 = arith.mulf %39, %30 : vector<37x6xf32>
    %cst_27 = arith.constant 0.000000e+00 : f32
    %41 = vector.broadcast %cst_27 : f32 to vector<37x6xf32>
    %42 = arith.maximumf %40, %41 : vector<37x6xf32>
    %43 = math.absf %40 : vector<37x6xf32>
    %cst_28 = arith.constant 0.000000e+00 : f32
    %44 = vector.broadcast %cst_28 : f32 to vector<37x6xf32>
    %45 = arith.subf %44, %43 : vector<37x6xf32>
    %46 = math.exp %45 : vector<37x6xf32>
    %47 = math.log1p %46 : vector<37x6xf32>
    %48 = arith.addf %42, %47 : vector<37x6xf32>
    %cst_29 = arith.constant 0.693147182 : f32
    %49 = vector.broadcast %cst_29 : f32 to vector<37x6xf32>
    %50 = arith.subf %49, %30 : vector<37x6xf32>
    %51 = arith.subf %50, %48 : vector<37x6xf32>
    %cst_30 = arith.constant 2.000000e+00 : f32
    %52 = vector.broadcast %cst_30 : f32 to vector<37x6xf32>
    %53 = arith.mulf %52, %51 : vector<37x6xf32>
    %54 = arith.subf %38, %53 : vector<37x6xf32>
    %cst_31 = arith.constant 2.000000e+00 : f32
    %55 = vector.broadcast %cst_31 : f32 to vector<37x6xf32>
    %56 = arith.mulf %55, %31 : vector<37x6xf32>
    %57 = tpu.transpose %56, [1, 0] : vector<37x6xf32> -> vector<6x37xf32>
    %c0_32 = arith.constant 0 : index
    %c0_33 = arith.constant 0 : index
    %c0_34 = arith.constant 0 : index
    %c0_35 = arith.constant 0 : index
    %58 = vector.load %arg11[%c0_32, %c0_33, %c0_34, %c0_35] : memref<1x1x6x37xf32, #tpu.memory_space<vmem>>, vector<1x1x6x37xf32>
    %59 = vector.shape_cast %58 : vector<1x1x6x37xf32> to vector<6x37xf32>
    %60 = vector.shape_cast %57 : vector<6x37xf32> to vector<1x1x6x37xf32>
    tpu.vector_store %arg11[%c0_32, %c0_33, %c0_34, %c0_35], %60 {strides = array<i32>} : memref<1x1x6x37xf32, #tpu.memory_space<vmem>>, vector<1x1x6x37xf32>,
    %61 = tpu.transpose %54, [1, 0] : vector<37x6xf32> -> vector<6x37xf32>
    %cst_36 = arith.constant dense<0.000000e+00> : vector<37xf32>
    %62 = vector.multi_reduction <add>, %61, %cst_36 [0] : vector<6x37xf32> to vector<37xf32>
    %63 = vector.shape_cast %62 : vector<37xf32> to vector<1x37xf32>
    %c0_37 = arith.constant 0 : index
    %c0_38 = arith.constant 0 : index
    %c0_39 = arith.constant 0 : index
    %c0_40 = arith.constant 0 : index
    %64 = vector.load %arg12[%c0_37, %c0_38, %c0_39, %c0_40] : memref<1x1x1x37xf32, #tpu.memory_space<vmem>>, vector<1x1x1x37xf32>
    %65 = vector.shape_cast %64 : vector<1x1x1x37xf32> to vector<1x37xf32>
    %66 = vector.shape_cast %63 : vector<1x37xf32> to vector<1x1x1x37xf32>
    tpu.vector_store %arg12[%c0_37, %c0_38, %c0_39, %c0_40], %66 {strides = array<i32>} : memref<1x1x1x37xf32, #tpu.memory_space<vmem>>, vector<1x1x1x37xf32>,
    return
  }
  func.func @transform_0(%arg0: i32, %arg1: i32) -> (i32, i32) {
    %c0_i32 = arith.constant 0 : i32
    %c0_i32_0 = arith.constant 0 : i32
    return %arg0, %c0_i32 : i32, i32
  }
  func.func @transform_1(%arg0: i32, %arg1: i32) -> (i32, i32, i32) {
    %c0_i32 = arith.constant 0 : i32
    %c0_i32_0 = arith.constant 0 : i32
    return %arg1, %arg0, %c0_i32 : i32, i32, i32
  }
  func.func @transform_2(%arg0: i32, %arg1: i32) -> (i32, i32) {
    %c0_i32 = arith.constant 0 : i32
    %c0_i32_0 = arith.constant 0 : i32
    %c0_i32_1 = arith.constant 0 : i32
    return %c0_i32, %c0_i32_0 : i32, i32
  }
  func.func @transform_3(%arg0: i32, %arg1: i32) -> (i32, i32) {
    %c0_i32 = arith.constant 0 : i32
    %c0_i32_0 = arith.constant 0 : i32
    %c0_i32_1 = arith.constant 0 : i32
    return %c0_i32, %c0_i32_0 : i32, i32
  }
  func.func @transform_4(%arg0: i32, %arg1: i32) -> (i32, i32) {
    %c0_i32 = arith.constant 0 : i32
    %c0_i32_0 = arith.constant 0 : i32
    %c0_i32_1 = arith.constant 0 : i32
    return %c0_i32, %c0_i32_0 : i32, i32
  }
  func.func @transform_5(%arg0: i32, %arg1: i32) -> (i32, i32) {
    %c0_i32 = arith.constant 0 : i32
    %c0_i32_0 = arith.constant 0 : i32
    %c0_i32_1 = arith.constant 0 : i32
    return %c0_i32, %c0_i32_0 : i32, i32
  }
  func.func @transform_6(%arg0: i32, %arg1: i32) -> (i32, i32) {
    %c0_i32 = arith.constant 0 : i32
    %c0_i32_0 = arith.constant 0 : i32
    %c0_i32_1 = arith.constant 0 : i32
    return %c0_i32, %c0_i32_0 : i32, i32
  }
  func.func @transform_7(%arg0: i32, %arg1: i32) -> (i32, i32) {
    %c0_i32 = arith.constant 0 : i32
    %c0_i32_0 = arith.constant 0 : i32
    %c0_i32_1 = arith.constant 0 : i32
    return %c0_i32, %c0_i32_0 : i32, i32
  }
  func.func @transform_8(%arg0: i32, %arg1: i32) -> (i32, i32) {
    %c0_i32 = arith.constant 0 : i32
    %c0_i32_0 = arith.constant 0 : i32
    %c0_i32_1 = arith.constant 0 : i32
    return %c0_i32, %c0_i32_0 : i32, i32
  }
  func.func @transform_9(%arg0: i32, %arg1: i32) -> (i32, i32, i32, i32) {
    %c0_i32 = arith.constant 0 : i32
    %c0_i32_0 = arith.constant 0 : i32
    %c0_i32_1 = arith.constant 0 : i32
    return %arg0, %arg1, %c0_i32, %c0_i32_0 : i32, i32, i32, i32
  }
  func.func @transform_10(%arg0: i32, %arg1: i32) -> (i32, i32, i32, i32) {
    %c0_i32 = arith.constant 0 : i32
    %c0_i32_0 = arith.constant 0 : i32
    %c0_i32_1 = arith.constant 0 : i32
    return %arg0, %arg1, %c0_i32, %c0_i32_0 : i32, i32, i32, i32
  }
}

</mosaic_0001>

<bundles_post_ra>
// kernel: gaussian_policy_forward.1
= control target key start
LH: loop header
LB: loop body
LE: loop exit
PB: predicated region body
PF: predicated region fallthrough
CT: control target
= control target key end

     0   :  { %16 = vsyncpa [#allocation3], 0  ;;  %v913_v2 = vmov 0.0|0.0   ;;  %vm914_vm0 = vmmov 0   ;;  %v915_v4 = vmov 0.0   ;;  %vm72_vm1 = vcmask 1040384   ;;  %s1233_s0 = inlined_call_operand.vmem [shape: f32[37,17], index: 0, kind: input, shape index: {}]   ;;  %s1234_s1 = inlined_call_operand.vmem [shape: f32[1,37,6], index: 1, kind: input, shape index: {}]   ;;  %s1235_s2 = inlined_call_operand.vmem [shape: f32[17,64], index: 2, kind: input, shape index: {}]   ;;  %s1236_s3 = inlined_call_operand.vmem [shape: f32[1,64], index: 3, kind: input, shape index: {}]   ;;  %s1237_s4 = inlined_call_operand.vmem [shape: f32[64,32], index: 4, kind: input, shape index: {}]   ;;  %s1238_s5 = inlined_call_operand.vmem [shape: f32[1,32], index: 5, kind: input, shape index: {}]   ;;  %s1239_s6 = inlined_call_operand.vmem [shape: f32[32,6], index: 6, kind: input, shape index: {}]   ;;  %s1240_s7 = inlined_call_operand.vmem [shape: f32[1,6], index: 7, kind: input, shape index: {}]   ;;  %s1241_s8 = inlined_call_operand.vmem [shape: f32[1,6], index: 8, kind: input, shape index: {}]   ;;  %s1242_s9 = inlined_call_operand.hbm [shape: f32[1,1,6,37], index: 9, kind: output, shape index: {0}]   ;;  %s1243_s10 = inlined_call_operand.hbm [shape: f32[1,1,1,37], index: 10, kind: output, shape index: {1}]  }
   0x1   :  { %v46_v0 = vld [vmem:[%s1235_s2] sm:$0xff]  ;;  %v47_v1 = vld [vmem:[%s1235_s2 + $0x8] sm:$0xff]  ;;  %803 = vmatprep.subr.bf16.mxu0 %v913_v2  ;;  %824 = vmatprep.subr.bf16.mxu1 %v913_v2  ;;  %v48_v5 = vld [vmem:[%s1235_s2 + $0x10] sm:$0x1]  ;;  %vm56_vm2 = vcmask 138240  }
   0x2   :  { %v804_v3 = vpack.c.bf16 %v47_v1, %v46_v0  ;;  %734 = vmatprep.mubr.msk.f32.mxu0 %vm914_vm0, %v915_v4  ;;  %740 = vmatprep.mubr.msk.f32.mxu1 %vm914_vm0, %v915_v4  ;;  %v171_v6 = vld [vmem:[%s1237_s4] sm:$0xff]  ;;  %v172_v7 = vld [vmem:[%s1237_s4 + $0x8] sm:$0xff]  ;;  %v43_v9 = vld [vmem:[%s1233_s0 + $0x10] sm:$0xff] }
   0x3   :  { %v41_v8 = vld [vmem:[%s1233_s0] sm:$0xff] }
   0x4   :  { %805 = vmatpush3.bf16.msra.mxu0 %v804_v3  ;;  %826 = vmatpush3.bf16.msra.mxu1 %v804_v3 }
   0x5   :  { %732 = vmatprep.subr.mxu0 %v915_v4  ;;  %825 = vmatprep.subr.mxu1 %v915_v4 }
   0x6   :  { %17 = vsyncpa [#allocation5], 0  ;;  %v807_v10 = vpack.c.bf16 %v172_v7, %v171_v6  ;;  %v173_v11 = vld [vmem:[%s1237_s4 + $0x10] sm:$0xff]  ;;  %v174_v12 = vld [vmem:[%s1237_s4 + $0x18] sm:$0xff]  ;;  %vm186_vm3 = vcmask 523264   ;;  %vm308_vm4 = vcmask 261120  }
   0x7   :  { %v42_v13 = vld [vmem:[%s1233_s0 + $0x8] sm:$0xff]  ;;  %v44_v14 = vld [vmem:[%s1233_s0 + $0x18] sm:$0xff]  ;;  %v810_v15 = vpack.c.bf16 %v174_v12, %v173_v11  ;;  %v175_v16 = vld [vmem:[%s1237_s4 + $0x20] sm:$0xff]  ;;  %v420_v12 = vlaneseq  ;;  %vm603_vm10 = vcmask 300032  }
   0x8   :  { %733 = vmatpush3.msk.msra.mxu0 %vm72_vm1, %v48_v5  ;;  %827 = vmatpush3.msk.msra.mxu1 %vm72_vm1, %v48_v5  ;;  %v176_v17 = vld [vmem:[%s1237_s4 + $0x28] sm:$0xff]  ;;  %v45_v18 = vld [vmem:[%s1233_s0 + $0x20] sm:$0x1f]  ;;  %v177_v20 = vld [vmem:[%s1237_s4 + $0x30] sm:$0xff] }
   0x9   :  { %735 = vmatmul.mubr.msk.f32.vlgmr.msra.gmra.mrb[0].mxu0 %vm56_vm2, %v41_v8  ;;  %741 = vmatmul.mubr.msk.f32.vlgmr.msra.gmra.mrb[0].mxu1 %vm56_vm2, %v43_v9  ;;  %v813_v19 = vpack.c.bf16 %v176_v17, %v175_v16  ;;  %v178_v21 = vld [vmem:[%s1237_s4 + $0x38] sm:$0xff]  ;;  %v297_v23 = vld [vmem:[%s1239_s6] sm:$0xff]  ;;  %v298_v24 = vld [vmem:[%s1239_s6 + $0x8] sm:$0xff] }
   0xa   :  { %737 = vmatprep.mubr.msk.f32.mxu0 %vm914_vm0, %v915_v4  ;;  %743 = vmatprep.mubr.msk.f32.mxu1 %vm914_vm0, %v915_v4  ;;  %v816_v22 = vpack.c.bf16 %v178_v21, %v177_v20  ;;  %v819_v25 = vpack.c.bf16 %v298_v24, %v297_v23  ;;  %v674_v26 = vld [vmem:[%s1236_s3] ss:$0 sm:$0xff]  ;;  %v299_v47 = vld [vmem:[%s1239_s6 + $0x10] sm:$0xff]  ;;  %v300_v48 = vld [vmem:[%s1239_s6 + $0x18] sm:$0xff] }
   0xb   :  { %806 = vmatprep.subr.bf16.mxu1 %v913_v2  ;;  %818 = vmatprep.subr.bf16.mxu0 %v913_v2  ;;  %v822_v49 = vpack.c.bf16 %v300_v48, %v299_v47  ;;  %v681_v50 = vld [vmem:[%s1238_s5] ss:$0 sm:$0xff]  ;;  %v1109_v20 = vld [vmem:[%s1234_s1 + $0x8] sm:$0xff] }
   0xc   :  { %808 = vmatpush3.bf16.msra.mxu1 %v807_v10  ;;  %820 = vmatpush3.bf16.msra.mxu0 %v819_v25  ;;  %v414_v8 = vld [vmem:[%s1241_s8] sm:$0x1] }
   0xd   :  { %738 = vmatmul.mubr.msk.f32.gmra.mrb[2].mxu0 %vm56_vm2, %v42_v13  ;;  %744 = vmatmul.mubr.msk.f32.gmra.mrb[2].mxu1 %vm56_vm2, %v44_v14  ;;  %v415_v9 = vmax.f32 %v414_v8, -20.0  ;;  %v1092_v13 = vshrl.u32 %v420_v12, 7  ;;  %v1100_v16 = vld [vmem:[%s1234_s1] sm:$0xff] }
   0xe   :  { %746 = vmatprep.mubr.msk.f32.mxu1 %vm914_vm0, %v915_v4  ;;  %809 = vmatprep.subr.bf16.mxu1 %v913_v2  ;;  %v687_v17 = vld [vmem:[%s1240_s7] ss:$0 sm:$0xff]  ;;  %v440_v8 = vmul.f32 -0.5, %v1100_v16 }
   0xf   :  { %788 = vmatprep.mubr.msk.f32.mxu0 %vm914_vm0, %v915_v4  ;;  %821 = vmatprep.subr.bf16.mxu0 %v913_v2  ;;  %v1089_v10 = vmin.f32 %v415_v9, 2.0  ;;  %v422_v14 = vsub.s32 0, %v1092_v13 }
  0x10   :  { %811 = vmatpush3.bf16.msra.mxu1 %v810_v15  ;;  %823 = vmatpush3.bf16.msra.mxu0 %v822_v49 }
  0x11   :  { %747 = vmatmul.mubr.msk.f32.gmra.mrb[4].mxu1 %vm56_vm2, %v45_v18  ;;  %812 = vmatprep.subr.bf16.mxu1 %v913_v2  ;;  %v417_v11 = vmul.f32 1.442695, %v1089_v10 }
  0x12   :  { %765 = vmatprep.mubr.msk.f32.mxu1 %vm914_vm0, %v915_v4 }
  0x13   :  { %833 = vpow2.f32 %v417_v11 }
  0x14   :  { %814 = vmatpush3.bf16.msra.mxu1 %v813_v19 }
  0x15   :  { %815 = vmatprep.subr.bf16.mxu1 %v913_v2 }
  0x18   :  { %817 = vmatpush3.bf16.msra.mxu1 %v816_v22 }
  0x1d   :  { %v834_v15 = vpop.eup %833 }
  0xdc   :  { %v142_v27 = vpop.f32.mrb[0].mxu0  ;;  %v152_v28 = vpop.f32.mrb[0].mxu1 }
  0xdd   :  { %v143_v29 = vadd.f32 %v674_v26, %v142_v27  ;;  %v736_v30 = vpop.f32.mrb[1].mxu0  ;;  %v742_v31 = vpop.f32.mrb[1].mxu1  ;;  %v153_v37 = vadd.f32 %v674_v26, %v152_v28 }
  0xdf   :  { %v166_v32 = vmax.f32 %v143_v29, 0.0  ;;  %v168_v41 = vmax.f32 %v153_v37, 0.0 }
  0xe0   :  { %v147_v33 = vpop.f32.mrb[2].mxu0  ;;  %v157_v34 = vpop.f32.mrb[2].mxu1 }
  0xe1   :  { %v148_v35 = vadd.f32 %v674_v26, %v147_v33  ;;  %v739_v36 = vpop.f32.mrb[3].mxu0  ;;  %766 = vmatmul.mubr.msk.f32.vlgmr.msra.gmra.mrb[6].mxu1 %vm186_vm3, %v166_v32  ;;  %v745_v38 = vpop.f32.mrb[3].mxu1  ;;  %v158_v42 = vadd.f32 %v674_v26, %v157_v34  ;;  %v1130_v34 = vld [vmem:[%s1234_s1 + $0x18] sm:$0xff] }
  0xe2   :  { %768 = vmatprep.mubr.msk.f32.mxu1 %vm914_vm0, %v915_v4 }
  0xe3   :  { %v167_v39 = vmax.f32 %v148_v35, 0.0  ;;  %v169_v44 = vmax.f32 %v158_v42, 0.0 }
  0xe4   :  { %v162_v40 = vpop.f32.mrb[4].mxu1 }
  0xe5   :  { %769 = vmatmul.mubr.msk.f32.gmra.mrb[8].mxu1 %vm186_vm3, %v167_v39  ;;  %v748_v43 = vpop.f32.mrb[5].mxu1  ;;  %v163_v45 = vadd.f32 %v674_v26, %v162_v40  ;;  %v1117_v26 = vld [vmem:[%s1234_s1 + $0x10] sm:$0xff] }
  0xe6   :  { %771 = vmatprep.mubr.msk.f32.mxu1 %vm914_vm0, %v915_v4 }
  0xe7   :  { %v170_v46 = vmax.f32 %v163_v45, 0.0 }
  0xe9   :  { %772 = vmatmul.mubr.msk.f32.gmra.mrb[10].mxu1 %vm186_vm3, %v168_v41 }
  0xea   :  { %774 = vmatprep.mubr.msk.f32.mxu1 %vm914_vm0, %v915_v4 }
  0xed   :  { %775 = vmatmul.mubr.msk.f32.gmra.mrb[12].mxu1 %vm186_vm3, %v169_v44  ;;  %v1143_v44 = vld [vmem:[%s1234_s1 + $0x20] sm:$0x1f]  ;;  %s916_s1 = smov [#allocation2]  }
  0xee   :  { %777 = vmatprep.mubr.msk.f32.mxu1 %vm914_vm0, %v915_v4  ;;  %s652_s22 = sshll.u32 %s916_s1, 4  ;;  %s653_s22 = int_to_ptr.vmem [resolvable:$true] %s652_s22 }
  0xef   :  { %s865_s0 = scalar_lea.vmem %s653_s22, 128  ;;  %p870_p1 = scmp.lt.s32.totalorder %s653_s22, %s653_s22 }
  0xf0   :  { %p866_p0 = scmp.ne.s32.totalorder %s653_s22, %s865_s0  ;;  %p871_p2 = scmp.lt.s32.totalorder %s865_s0, %s865_s0 }
  0xf1   :  { %778 = vmatmul.mubr.msk.f32.gmra.mrb[14].mxu1 %vm186_vm3, %v170_v46 }
  0xf2   :  { %p872_p3 = por %p871_p2, %p870_p1 }
  0xf4   :  { %p873_p4 = pnand %p872_p3, %p866_p0 }
 0x1b4   :  { %v268_v51 = vpop.f32.mrb[6].mxu1 }
 0x1b5   :  { %v269_v52 = vadd.f32 %v681_v50, %v268_v51  ;;  %v767_v53 = vpop.f32.mrb[7].mxu1 }
 0x1b7   :  { %v292_v54 = vmax.f32 %v269_v52, 0.0 }
 0x1b8   :  { %v273_v55 = vpop.f32.mrb[8].mxu1 }
 0x1b9   :  { %v274_v56 = vadd.f32 %v681_v50, %v273_v55  ;;  %v770_v57 = vpop.f32.mrb[9].mxu1  ;;  %789 = vmatmul.mubr.msk.f32.vlgmr.msra.gmra.mrb[4].mxu0 %vm308_vm4, %v292_v54 }
 0x1ba   :  { %791 = vmatprep.mubr.msk.f32.mxu0 %vm914_vm0, %v915_v4 }
 0x1bb   :  { %v293_v58 = vmax.f32 %v274_v56, 0.0 }
 0x1bc   :  { %v278_v59 = vpop.f32.mrb[10].mxu1 }
 0x1bd   :  { %v279_v60 = vadd.f32 %v681_v50, %v278_v59  ;;  %v773_v61 = vpop.f32.mrb[11].mxu1  ;;  %792 = vmatmul.mubr.msk.f32.gmra.mrb[6].mxu0 %vm308_vm4, %v293_v58 }
 0x1be   :  { %794 = vmatprep.mubr.msk.f32.mxu0 %vm914_vm0, %v915_v4 }
 0x1bf   :  { %v294_v62 = vmax.f32 %v279_v60, 0.0 }
 0x1c0   :  { %v283_v63 = vpop.f32.mrb[12].mxu1 }
 0x1c1   :  { %v284_v0 = vadd.f32 %v681_v50, %v283_v63  ;;  %v776_v1 = vpop.f32.mrb[13].mxu1  ;;  %795 = vmatmul.mubr.msk.f32.gmra.mrb[8].mxu0 %vm308_vm4, %v294_v62 }
 0x1c2   :  { %797 = vmatprep.mubr.msk.f32.mxu0 %vm914_vm0, %v915_v4 }
 0x1c3   :  { %v295_v2 = vmax.f32 %v284_v0, 0.0 }
 0x1c4   :  { %v288_v3 = vpop.f32.mrb[14].mxu1 }
 0x1c5   :  { %v289_v5 = vadd.f32 %v681_v50, %v288_v3  ;;  %v779_v6 = vpop.f32.mrb[15].mxu1  ;;  %798 = vmatmul.mubr.msk.f32.gmra.mrb[10].mxu0 %vm308_vm4, %v295_v2 }
 0x1c6   :  { %800 = vmatprep.mubr.msk.f32.mxu0 %vm914_vm0, %v915_v4  ;;  %v423_v4 = vrot.slane %v834_v15, %v422_v14 }
 0x1c7   :  { %v296_v7 = vmax.f32 %v289_v5, 0.0 }
 0x1c8   :  { %v425_v18 = vmul.f32 %v423_v4, %v1100_v16  ;;  %v426_v24 = vmul.f32 %v423_v4, %v1109_v20  ;;  %v427_v32 = vmul.f32 %v423_v4, %v1117_v26  ;;  %v428_v42 = vmul.f32 %v423_v4, %v1130_v34 }
 0x1c9   :  { %801 = vmatmul.mubr.msk.f32.gmra.mrb[12].mxu0 %vm308_vm4, %v296_v7  ;;  %v429_v53 = vmul.f32 %v423_v4, %v1143_v44 }
 0x28c   :  { %v390_v19 = vpop.f32.mrb[4].mxu0 }
 0x28d   :  { %v391_v21 = vadd.f32 %v687_v17, %v390_v19  ;;  %v790_v22 = vpop.f32.mrb[5].mxu0  ;;  %v445_v19 = vmul.f32 %v440_v8, %v1100_v16 }
 0x28f   :  { %v1111_v23 = vadd.f32 %v425_v18, %v391_v21  ;;  %v1171_v21 = vrot.slane %v1089_v10, %v422_v14 }
 0x290   :  { %v395_v25 = vpop.f32.mrb[6].mxu0 }
 0x291   :  { %v1120_v27 = vmul.f32 -2.0, %v1111_v23  ;;  %v396_v28 = vadd.f32 %v687_v17, %v395_v25  ;;  %v793_v29 = vpop.f32.mrb[7].mxu0  ;;  %835 = vtanh.f32 %v1111_v23 }
 0x293   :  { %v476_v30 = vand.u32 2147483647, %v1120_v27  ;;  %v1124_v31 = vadd.f32 %v426_v24, %v396_v28 }
 0x294   :  { %v400_v33 = vpop.f32.mrb[8].mxu0 }
 0x295   :  { %v481_v35 = vsub.f32 0.0, %v476_v30  ;;  %v1133_v36 = vmul.f32 -2.0, %v1124_v31  ;;  %v401_v37 = vadd.f32 %v687_v17, %v400_v33  ;;  %v796_v38 = vpop.f32.mrb[9].mxu0  ;;  %837 = vtanh.f32 %v1124_v31 }
 0x296   :  { %v442_v38 = vmul.f32 -0.5, %v1117_v26 }
 0x297   :  { %v486_v39 = vmul.f32 1.442695, %v481_v35  ;;  %v477_v40 = vand.u32 2147483647, %v1133_v36  ;;  %v1137_v41 = vadd.f32 %v427_v32, %v401_v37  ;;  %v456_v32 = vsub.f32 %v445_v19, %v1171_v21 }
 0x298   :  { %v405_v43 = vpop.f32.mrb[10].mxu0 }
 0x299   :  { %839 = vpow2.f32 %v486_v39  ;;  %v482_v45 = vsub.f32 0.0, %v477_v40  ;;  %v1146_v46 = vmul.f32 -2.0, %v1137_v41  ;;  %v406_v47 = vadd.f32 %v687_v17, %v405_v43  ;;  %v799_v48 = vpop.f32.mrb[11].mxu0 }
 0x29a   :  { %841 = vtanh.f32 %v1137_v41  ;;  %v693_v40 = vadd.f32 -0.9189385, %v456_v32  ;;  %v471_v48 = vmax.f32 %v1120_v27, 0.0 }
 0x29b   :  { %v836_v49 = vpop.eup %835  ;;  %v488_v50 = vmul.f32 1.442695, %v482_v45  ;;  %v478_v51 = vand.u32 2147483647, %v1146_v46  ;;  %v1150_v52 = vadd.f32 %v428_v42, %v406_v47 }
 0x29c   :  { %v410_v54 = vpop.f32.mrb[12].mxu0  ;;  %v566_v55 = vmul.f32 2.0, %v836_v49 }
 0x29d   :  { %843 = vpow2.f32 %v488_v50  ;;  %v483_v56 = vsub.f32 0.0, %v478_v51  ;;  %v1154_v57 = vmul.f32 -2.0, %v1150_v52  ;;  %v411_v58 = vadd.f32 %v687_v17, %v410_v54  ;;  %v802_v59 = vpop.f32.mrb[13].mxu0 }
 0x29e   :  { %571 = vxpose.xlu1.b32.start [1/5] (short) (narrow) %v566_v55, 8  ;;  %845 = vtanh.f32 %v1150_v52  ;;  %v441_v17 = vmul.f32 -0.5, %v1109_v20  ;;  %v447_v54 = vmul.f32 %v442_v38, %v1117_v26  ;;  %v443_v55 = vmul.f32 -0.5, %v1130_v34 }
 0x29f   :  { %v838_v60 = vpop.eup %837  ;;  %v490_v61 = vmul.f32 1.442695, %v483_v56  ;;  %v479_v62 = vand.u32 2147483647, %v1154_v57  ;;  %v1158_v63 = vadd.f32 %v429_v53, %v411_v58  ;;  %v546_v59 = vsub.f32 0.6931472, %v1111_v23 }
 0x2a0   :  { %v567_v0 = vmul.f32 2.0, %v838_v60  ;;  %v446_v29 = vmul.f32 %v441_v17, %v1109_v20  ;;  %v472_v60 = vmax.f32 %v1133_v36, 0.0  ;;  %v444_v23 = vmul.f32 -0.5, %v1143_v44 }
 0x2a1   :  { %847 = vpow2.f32 %v490_v61  ;;  %v484_v1 = vsub.f32 0.0, %v479_v62  ;;  %v1161_v2 = vmul.f32 -2.0, %v1158_v63 }
 0x2a2   :  { %572 = vxpose.xlu1.b32.cont [2/5] (short) (narrow) %v567_v0, 8  ;;  %849 = vtanh.f32 %v1158_v63  ;;  %v457_v14 = vsub.f32 %v446_v29, %v1171_v21 }
 0x2a3   :  { %v840_v3 = vpop.eup %839  ;;  %v492_v5 = vmul.f32 1.442695, %v484_v1  ;;  %v480_v6 = vand.u32 2147483647, %v1161_v2 }
 0x2a4   :  { %v842_v7 = vpop.eup %841  ;;  %v496_v9 = vadd.f32 1.0, %v840_v3  ;;  %v499_v25 = vmul.f32 -0.5, %v840_v3  ;;  %v502_v13 = vand.u32 2147483647, %v840_v3  ;;  %v694_v53 = vadd.f32 -0.9189385, %v457_v14 }
 0x2a5   :  { %851 = vpow2.f32 %v492_v5  ;;  %v485_v11 = vsub.f32 0.0, %v480_v6  ;;  %v568_v12 = vmul.f32 2.0, %v842_v7  ;;  %v458_v6 = vsub.f32 %v447_v54, %v1171_v21 }
 0x2a6   :  { %853 = vlog2.f32 %v496_v9  ;;  %v500_v16 = vadd.f32 1.0, %v499_v25  ;;  %vm503_vm5 = vcmp.lt.f32.partialorder %v502_v13, 0.0004427343  ;;  %v448_v7 = vmul.f32 %v443_v55, %v1130_v34 }
 0x2a7   :  { %v844_v15 = vpop.eup %843  ;;  %v494_v4 = vmul.f32 1.442695, %v485_v11  ;;  %573 = vxpose.xlu1.b32.cont [3/5] (short) (narrow) %v568_v12, 8  ;;  %v547_v11 = vsub.f32 0.6931472, %v1124_v31  ;;  %v473_v12 = vmax.f32 %v1146_v46, 0.0 }
 0x2a8   :  { %v846_v18 = vpop.eup %845  ;;  %v505_v22 = vadd.f32 1.0, %v844_v15  ;;  %v508_v37 = vmul.f32 -0.5, %v844_v15  ;;  %v501_v43 = vmul.f32 %v840_v3, %v500_v16  ;;  %v511_v49 = vand.u32 2147483647, %v844_v15 }
 0x2a9   :  { %855 = vpow2.f32 %v494_v4  ;;  %v569_v24 = vmul.f32 2.0, %v846_v18  ;;  %v695_v34 = vadd.f32 -0.9189385, %v458_v6  ;;  %v459_v29 = vsub.f32 %v448_v7, %v1171_v21 }
 0x2aa   :  { %857 = vlog2.f32 %v505_v22  ;;  %v509_v45 = vadd.f32 1.0, %v508_v37  ;;  %vm512_vm6 = vcmp.lt.f32.partialorder %v511_v49, 0.0004427343  ;;  %v548_v46 = vsub.f32 0.6931472, %v1137_v41 }
 0x2ab   :  { %v848_v28 = vpop.eup %847  ;;  %574 = vxpose.xlu1.b32.cont [4/5] (short) (narrow) %v569_v24, 8  ;;  %v549_v41 = vsub.f32 0.6931472, %v1150_v52  ;;  %v550_v54 = vsub.f32 0.6931472, %v1158_v63 }
 0x2ac   :  { %v850_v30 = vpop.eup %849  ;;  %v514_v33 = vadd.f32 1.0, %v848_v28  ;;  %v517_v47 = vmul.f32 -0.5, %v848_v28  ;;  %v510_v62 = vmul.f32 %v844_v15, %v509_v45  ;;  %v520_v5 = vand.u32 2147483647, %v848_v28 }
 0x2ad   :  { %v570_v35 = vmul.f32 2.0, %v850_v30 }
 0x2ae   :  { %859 = vlog2.f32 %v514_v33  ;;  %v518_v0 = vadd.f32 1.0, %v517_v47  ;;  %vm521_vm7 = vcmp.lt.f32.partialorder %v520_v5, 0.0004427343  ;;  %v474_v33 = vmax.f32 %v1154_v57, 0.0 }
 0x2af   :  { %v1175_v10 = vpop.eup %851  ;;  %575 = vxpose.xlu1.b32.end [5/5] (short) (narrow) %v570_v35, 8 }
 0x2b0   :  { %v854_v39 = vpop.eup %853  ;;  %v523_v20 = vadd.f32 1.0, %v1175_v10  ;;  %v526_v1 = vmul.f32 -0.5, %v1175_v10  ;;  %v519_v4 = vmul.f32 %v848_v28, %v518_v0  ;;  %v529_v24 = vand.u32 2147483647, %v1175_v10 }
 0x2b1   :  { %v498_v42 = vmul.f32 0.6931472, %v854_v39  ;;  %v449_v28 = vmul.f32 %v444_v23, %v1143_v44 }
 0x2b2   :  { %861 = vlog2.f32 %v523_v20  ;;  %v527_v17 = vadd.f32 1.0, %v526_v1  ;;  %vm530_vm8 = vcmp.lt.f32.partialorder %v529_v24, 0.0004427343 }
 0x2b3   :  { %v1181_v50 = vpop.eup %855  ;;  %v504_v51 = vsel %vm503_vm5, %v501_v43, %v498_v42  ;;  %v696_v43 = vadd.f32 -0.9189385, %v459_v29  ;;  %v460_v44 = vsub.f32 %v449_v28, %v1171_v21 }
 0x2b4   :  { %v858_v56 = vpop.eup %857  ;;  %v541_v58 = vadd.f32 %v504_v51, %v471_v48  ;;  %v532_v61 = vadd.f32 1.0, %v1181_v50  ;;  %v535_v18 = vmul.f32 -0.5, %v1181_v50  ;;  %v528_v16 = vmul.f32 %v1175_v10, %v527_v17 }
 0x2b5   :  { %v507_v27 = vmul.f32 0.6931472, %v858_v56  ;;  %v538_v38 = vand.u32 2147483647, %v1181_v50  ;;  %v475_v48 = vmax.f32 %v1161_v2, 0.0 }
 0x2b6   :  { %v551_v3 = vsub.f32 %v546_v59, %v541_v58  ;;  %863 = vlog2.f32 %v532_v61  ;;  %v536_v37 = vadd.f32 1.0, %v535_v18  ;;  %v697_v56 = vadd.f32 -0.9189385, %v460_v44 }
 0x2b7   :  { %v513_v26 = vsel %vm512_vm6, %v510_v62, %v507_v27  ;;  %vm539_vm9 = vcmp.lt.f32.partialorder %v538_v38, 0.0004427343 }
 0x2b8   :  { %v860_v8 = vpop.eup %859  ;;  %v556_v36 = vmul.f32 2.0, %v551_v3  ;;  %v542_v9 = vadd.f32 %v513_v26, %v472_v60  ;;  %v537_v45 = vmul.f32 %v1181_v50, %v536_v37 }
 0x2b9   :  { %v516_v15 = vmul.f32 0.6931472, %v860_v8 }
 0x2ba   :  { %v561_v19 = vsub.f32 %v693_v40, %v556_v36  ;;  %v552_v22 = vsub.f32 %v547_v11, %v542_v9 }
 0x2bb   :  { %v522_v25 = vsel %vm521_vm7, %v519_v4, %v516_v15 }
 0x2bc   :  { %v862_v30 = vpop.eup %861  ;;  %605 = vxpose.xlu0.b32.start [1/5] (short) (narrow) %v561_v19, 8  ;;  %v557_v32 = vmul.f32 2.0, %v552_v22  ;;  %v543_v31 = vadd.f32 %v522_v25, %v473_v12 }
 0x2bd   :  { %v525_v35 = vmul.f32 0.6931472, %v862_v30 }
 0x2be   :  { %v562_v13 = vsub.f32 %v694_v53, %v557_v32  ;;  %v553_v14 = vsub.f32 %v548_v46, %v543_v31 }
 0x2bf   :  { %v531_v39 = vsel %vm530_vm8, %v528_v16, %v525_v35 }
 0x2c0   :  { %v864_v40 = vpop.eup %863  ;;  %606 = vxpose.xlu0.b32.cont [2/5] (short) (narrow) %v562_v13, 8  ;;  %v558_v20 = vmul.f32 2.0, %v553_v14  ;;  %v544_v42 = vadd.f32 %v531_v39, %v474_v33 }
 0x2c1   :  { %v534_v57 = vmul.f32 0.6931472, %v864_v40 }
 0x2c2   :  { %v563_v10 = vsub.f32 %v695_v34, %v558_v20  ;;  %v554_v47 = vsub.f32 %v549_v41, %v544_v42 }
 0x2c3   :  { %v540_v49 = vsel %vm539_vm9, %v537_v45, %v534_v57 }
 0x2c4   :  { %607 = vxpose.xlu0.b32.cont [3/5] (short) (narrow) %v563_v10, 8  ;;  %v559_v51 = vmul.f32 2.0, %v554_v47  ;;  %v545_v53 = vadd.f32 %v540_v49, %v475_v48 }
 0x2c6   :  { %v564_v55 = vsub.f32 %v696_v43, %v559_v51  ;;  %v555_v52 = vsub.f32 %v550_v54, %v545_v53 }
 0x2c8   :  { %608 = vxpose.xlu0.b32.cont [4/5] (short) (narrow) %v564_v55, 8  ;;  %v560_v58 = vmul.f32 2.0, %v555_v52 }
 0x2ca   :  { %v565_v21 = vsub.f32 %v697_v56, %v560_v58 }
 0x2cc   :  { %609 = vxpose.xlu0.b32.end [5/5] (short) (narrow) %v565_v21, 8 }
 0x31f   :  { %v587_v50 = vpop.trf.xlu1 }
 0x320   :  { %604 = vst.msk [vmem:[#allocation2] sm:$0x3f] %vm603_vm10, %v587_v50 }
 0x321   :  { %876 = shalt.err (!%p873_p4)
}
 0x322   :  { %s877_s25 = scalar_lea.hbm %s1242_s9, 128 }
 0x323   :  { %p878_p5 = scmp.ne.s32.totalorder %s1242_s9, %s877_s25  ;;  %p881_p6 = scmp.lt.u32.totalorder %s877_s25, %s1242_s9 }
 0x325   :  { %p883_p7 = pnand %p881_p6, %p878_p5 }
 0x327   :  { %886 = shalt.err (!%p883_p7)
}
 0x328   :  { %655 = dma.vmem_to_hbm [thread:$0]  %s653_s22, 128, %s1242_s9, [#allocation3]   ;;  %vm644_vm11 = vcmask 294912  }
 0x329   :  { %s917_s29 = smov [#allocation4]  }
 0x32a   :  { %s662_s30 = sshll.u32 %s917_s29, 4  ;;  %s663_s30 = int_to_ptr.vmem [resolvable:$true] %s662_s30 }
 0x32b   :  { %s887_s11 = scalar_lea.vmem %s663_s30, 16  ;;  %s891_s5 = scalar_lea.vmem %s663_s30, 32 }
 0x32c   :  { %p888_p8 = scmp.ne.s32.totalorder %s663_s30, %s887_s11  ;;  %p892_p9 = scmp.lt.s32.totalorder %s663_s30, %s663_s30 }
 0x32d   :  { %p893_p10 = scmp.lt.s32.totalorder %s891_s5, %s887_s11 }
 0x32f   :  { %p894_p11 = por %p893_p10, %p892_p9 }
 0x331   :  { %p895_p12 = pnand %p894_p11, %p888_p8 }
 0x33c   :  { %v621_v63 = vpop.trf.xlu0 }
 0x33d   :  { %v637_v2 = vsel %vm603_vm10, %v621_v63, 0.0 }
 0x33e   :  { %v638_v59 = vrot.slane %v637_v2, 4 }
 0x340   :  { %v639_v60 = vadd.f32 %v638_v59, %v637_v2 }
 0x342   :  { %v640_v61 = vrot.slane %v639_v60, 2 }
 0x344   :  { %v641_v27 = vadd.f32 %v640_v61, %v639_v60 }
 0x346   :  { %v642_v62 = vrot.slane %v641_v27, 1 }
 0x348   :  { %v643_v0 = vadd.f32 %v642_v62, %v641_v27 }
 0x34a   :  { %645 = vst.msk [vmem:[#allocation4] sm:$0x1] %vm644_vm11, %v643_v0 }
 0x34b   :  { %898 = shalt.err (!%p895_p12)
}
 0x34c   :  { %s899_s12 = scalar_lea.hbm %s1243_s10, 16 }
 0x34d   :  { %p900_p13 = scmp.ne.s32.totalorder %s1243_s10, %s899_s12  ;;  %p903_p0 = scmp.lt.u32.totalorder %s899_s12, %s1243_s10 }
 0x34f   :  { %p905_p1 = pnand %p903_p0, %p900_p13 }
 0x351   :  { %908 = shalt.err (!%p905_p1)
}
 0x352   :  { %665 = dma.vmem_to_hbm [thread:$0]  %s663_s30, 16, %s1243_s10, [#allocation5]  }
 0x353   :  { %909 = dma.done.wait [#allocation3], 128  }
 0x354   :  { %910 = vsyncadd [#allocation3], 4294967168 }
 0x355   :  { %911 = dma.done.wait [#allocation5], 16  }
 0x356   :  { %912 = vsyncadd [#allocation5], 4294967280 }
 0x357   :  { %672 = vsyncpa [#allocation3], 1 }
 0x358   :  { %673 = vsyncpa [#allocation5], 1 }

</bundles_post_ra>
